<compile_context>
chip_gen: v5e
topology: v5e:2x2
jax: 0.10.0
libtpu: 0.0.40
codegen_flags: <defaults>
</compile_context>

<pallas_src>
import functools

import jax
import jax.numpy as jnp
from jax.experimental import pallas as pl
from jax.experimental.pallas import tpu as pltpu


def _round_up(x, m):
    return ((x + m - 1) // m) * m


_H1, _H2 = 64, 32          # encoder hidden widths
_S1, _S2 = 16, 8           # siamese shared-trunk widths
_LEAKY_SLOPE = 0.1         # TODO(synk): slope of the (unspecified) LeakyReLU layers


def _leaky(z):
    # max(z, a*z) == LeakyReLU(z) for 0 < a < 1; one fewer VPU op than where().
    return jnp.maximum(z, _LEAKY_SLOPE * z)


def _globalmodel_kernel(
    x_ref,                                              # [1, C, T] input pixels (channel-major)
    w0_ref, b0_ref, w1_ref, b1_ref, w2_ref, b2_ref,     # encoder   (weights [out, in], bf16)
    wd_ref,                                             # decoder endmember matrix [C, E] (bf16)
    ws0_ref, bs0_ref, ws1_ref, bs1_ref,                 # siamese shared trunk (bf16 weights)
    wp_ref, bp_ref,                                     # siamese p-head (f32, used on VPU)
    out1_ref,                                           # [1, E, T] abundances (output1)
    out5_ref,                                           # [1, C, T] combined recon (output5)
):
    x = x_ref[0, :, :]                                  # [C, T]

    def mm(w_ref, a):
        # MXU matmul, bf16 inputs, f32 accumulation.  Big dim (pixels) on lanes.
        return jnp.dot(w_ref[...], a.astype(jnp.bfloat16),
                       preferred_element_type=jnp.float32)

    # ---- EncoderNet: 1x1-conv MLP + LeakyReLU, softmax over end-members ----
    h = _leaky(mm(w0_ref, x) + b0_ref[...])             # [H1, T]
    h = _leaky(mm(w1_ref, h) + b1_ref[...])             # [H2, T]
    logits = mm(w2_ref, h) + b2_ref[...]                # [E,  T]
    logits = logits - jnp.max(logits, axis=0, keepdims=True)
    ez = jnp.exp(logits)
    abund = ez / jnp.sum(ez, axis=0, keepdims=True)     # exact softmax (sums to 1)
    out1_ref[0, :, :] = abund.astype(out1_ref.dtype)

    # ---- Decoder: linear mixing with (non-negative) endmember matrix ----
    y = mm(wd_ref, abund)                               # [C, T]

    # ---- Square_Layer: quadratic interaction term ----
    yx = y * y                                          # [C, T]

    # ---- SiameseNetwork: shared trunk on (y, yx); p-head on the VPU ----
    def shared(z):
        f = _leaky(mm(ws0_ref, z) + bs0_ref[...])       # [S1, T]
        f = _leaky(mm(ws1_ref, f) + bs1_ref[...])       # [S2, T]
        return f

    d = jnp.abs(shared(y) - shared(yx))                 # [S2, T]
    p_learn = jax.nn.sigmoid(
        jnp.sum(wp_ref[...] * d, axis=0, keepdims=True) + bp_ref[...])   # [1, T]

    # ---- Combination: linear recon + p * nonlinear term ----
    out5_ref[0, :, :] = (y + p_learn * yx).astype(out5_ref.dtype)


@functools.lru_cache(maxsize=None)
def _vmem_limit_bytes():
    """Scoped-VMEM limit with headroom: ~48 MiB on v7x (64 MiB), ~96 MiB on v5e/v6e."""
    cap = 128 << 20
    try:
        cap = int(getattr(pltpu.get_tpu_info(), "vmem_capacity_bytes", cap))
    except Exception:
        pass
    return int(min(cap - (16 << 20), 96 << 20))


def _pick_tile(C, E, HW, tile_cap, x_bytes, out_bytes, vmem_limit):
    """Largest lane-aligned pixel tile whose per-step VMEM fits the budget."""
    # Double-buffered I/O blocks per pixel column + rough intermediate footprint.
    io_per_col = 2 * C * x_bytes + 2 * E * out_bytes + 2 * C * out_bytes
    interm_per_col = 18 * C + 12 * E + 700
    per_col = io_per_col + interm_per_col
    usable = int(vmem_limit * 0.7)
    max_tile = max(128, (usable // per_col) // 128 * 128)
    tile = min(int(tile_cap), max_tile, _round_up(HW, 128))
    return max(128, (tile // 128) * 128)


def make_params(num_bands, end_members, key):
    """Deterministic parameter init (weights stored [out_features, in_features])."""
    ks = jax.random.split(key, 8)

    def lin(k, fan_out, fan_in):
        return (jax.random.normal(k, (fan_out, fan_in), jnp.float32)
                * (1.0 / jnp.sqrt(jnp.float32(fan_in))))

    col = lambda n: jnp.zeros((n, 1), jnp.float32)

    return dict(
        w0=lin(ks[0], _H1, num_bands),        b0=col(_H1),
        w1=lin(ks[1], _H2, _H1),              b1=col(_H2),
        w2=lin(ks[2], end_members, _H2),      b2=col(end_members),
        wd=jnp.abs(lin(ks[3], num_bands, end_members)),   # non-negative endmembers
        ws0=lin(ks[4], _S1, num_bands),       bs0=col(_S1),
        ws1=lin(ks[5], _S2, _S1),             bs1=col(_S2),
        wp=lin(ks[6], _S2, 1),                bp=col(1),
    )


@functools.partial(jax.jit, static_argnames=("end_members", "tile_cols", "out_dtype"))
def globalmodel_forward(img, params, *, end_members=4, tile_cols=8192,
                        out_dtype=jnp.float32):
    """img: [B, num_bands, H, W] (NCHW).  Returns (output1, output5) in NCHW."""
    B, C, H, W = img.shape
    E = end_members
    HW = H * W

    # Pure row-major view: NCHW -> [B, C, H*W].  No transpose, no pad, no astype.
    x = img.reshape(B, C, HW)

    vmem_limit = _vmem_limit_bytes()
    tile = _pick_tile(C, E, HW,
                      tile_cap=tile_cols,
                      x_bytes=jnp.dtype(x.dtype).itemsize,
                      out_bytes=jnp.dtype(out_dtype).itemsize,
                      vmem_limit=vmem_limit)
    n_tiles = pl.cdiv(HW, tile)     # ragged tail handled by Pallas block masking

    p = params
    mm_names = ("w0", "w1", "w2", "wd", "ws0", "ws1")      # fed to the MXU -> bf16
    names = ("w0", "b0", "w1", "b1", "w2", "b2", "wd",
             "ws0", "bs0", "ws1", "bs1", "wp", "bp")
    weights = [p[n].astype(jnp.bfloat16) if n in mm_names else p[n].astype(jnp.float32)
               for n in names]

    wspec = lambda arr: pl.BlockSpec(arr.shape, lambda j, b: (0, 0))

    out1, out5 = pl.pallas_call(
        _globalmodel_kernel,
        out_shape=(
            jax.ShapeDtypeStruct((B, E, HW), out_dtype),
            jax.ShapeDtypeStruct((B, C, HW), out_dtype),
        ),
        grid_spec=pltpu.PrefetchScalarGridSpec(
            num_scalar_prefetch=0,
            # Long pixel-tile axis first so v7x's two TensorCores both get work
            # even when B == 1 (no effect on single-TC v5e/v6e).
            grid=(n_tiles, B),
            in_specs=[pl.BlockSpec((1, C, tile), lambda j, b: (b, 0, j))]
                     + [wspec(w) for w in weights],
            out_specs=[
                pl.BlockSpec((1, E, tile), lambda j, b: (b, 0, j)),
                pl.BlockSpec((1, C, tile), lambda j, b: (b, 0, j)),
            ],
        ),
        compiler_params=pltpu.CompilerParams(
            dimension_semantics=("parallel", "parallel"),
            vmem_limit_bytes=vmem_limit),
    )(x, *weights)

    # Pure metadata reshapes back to NCHW spatial dims (no slicing, no copies).
    output1 = out1.reshape(B, E, H, W)
    output5 = out5.reshape(B, C, H, W)
    return output1, output5


if __name__ == "__main__":
    # Small shapes consistent with the module (num_bands kept small for the demo).
    B, num_bands, H, W = 2, 32, 16, 16
    end_members = 4

    key = jax.random.PRNGKey(0)
    k_img, k_par = jax.random.split(key)
    img = jax.random.uniform(k_img, (B, num_bands, H, W), jnp.float32)
    params = make_params(num_bands, end_members, k_par)

    out1, out5 = globalmodel_forward(img, params, end_members=end_members)
    jax.block_until_ready((out1, out5))

    assert out1.shape == (B, end_members, H, W)
    assert out5.shape == (B, num_bands, H, W)
    # Abundances sum to one per pixel (exact softmax division in the kernel).
    assert float(jnp.max(jnp.abs(out1.sum(axis=1) - 1.0))) < 1e-4
    assert bool(jnp.all(jnp.isfinite(out1)))
    assert bool(jnp.all(jnp.isfinite(out5)))

    print("KERNEL_OK")
</pallas_src>

<mosaic_0001>
module attributes {stable_mosaic.version = 11 : i64} {
  func.func @_globalmodel_kernel(%arg0: i32, %arg1: i32, %arg2: memref<1x32x256xf32, #tpu.memory_space<vmem>>, %arg3: memref<64x32xbf16, #tpu.memory_space<vmem>>, %arg4: memref<64x1xf32, #tpu.memory_space<vmem>>, %arg5: memref<32x64xbf16, #tpu.memory_space<vmem>>, %arg6: memref<32x1xf32, #tpu.memory_space<vmem>>, %arg7: memref<4x32xbf16, #tpu.memory_space<vmem>>, %arg8: memref<4x1xf32, #tpu.memory_space<vmem>>, %arg9: memref<32x4xbf16, #tpu.memory_space<vmem>>, %arg10: memref<16x32xbf16, #tpu.memory_space<vmem>>, %arg11: memref<16x1xf32, #tpu.memory_space<vmem>>, %arg12: memref<8x16xbf16, #tpu.memory_space<vmem>>, %arg13: memref<8x1xf32, #tpu.memory_space<vmem>>, %arg14: memref<8x1xf32, #tpu.memory_space<vmem>>, %arg15: memref<1x1xf32, #tpu.memory_space<vmem>>, %arg16: memref<1x4x256xf32, #tpu.memory_space<vmem>>, %arg17: memref<1x32x256xf32, #tpu.memory_space<vmem>>) attributes {dimension_semantics = [#tpu.dimension_semantics<parallel>, #tpu.dimension_semantics<parallel>], iteration_bounds = array<i64: 1, 2>, scalar_prefetch = 0 : i64, scratch_operands = 0 : i64, tpu.core_type = #tpu.core_type<tc>, window_params = [{transform_indices = @transform_0, window_bounds = array<i64: 1, 32, 256>}, {pipeline_mode = #tpu.pipeline_mode<synchronous>, transform_indices = @transform_1, window_bounds = array<i64: 64, 32>}, {pipeline_mode = #tpu.pipeline_mode<synchronous>, transform_indices = @transform_2, window_bounds = array<i64: 64, 1>}, {pipeline_mode = #tpu.pipeline_mode<synchronous>, transform_indices = @transform_3, window_bounds = array<i64: 32, 64>}, {pipeline_mode = #tpu.pipeline_mode<synchronous>, transform_indices = @transform_4, window_bounds = array<i64: 32, 1>}, {pipeline_mode = #tpu.pipeline_mode<synchronous>, transform_indices = @transform_5, window_bounds = array<i64: 4, 32>}, {pipeline_mode = #tpu.pipeline_mode<synchronous>, transform_indices = @transform_6, window_bounds = array<i64: 4, 1>}, {pipeline_mode = #tpu.pipeline_mode<synchronous>, transform_indices = @transform_7, window_bounds = array<i64: 32, 4>}, {pipeline_mode = #tpu.pipeline_mode<synchronous>, transform_indices = @transform_8, window_bounds = array<i64: 16, 32>}, {pipeline_mode = #tpu.pipeline_mode<synchronous>, transform_indices = @transform_9, window_bounds = array<i64: 16, 1>}, {pipeline_mode = #tpu.pipeline_mode<synchronous>, transform_indices = @transform_10, window_bounds = array<i64: 8, 16>}, {pipeline_mode = #tpu.pipeline_mode<synchronous>, transform_indices = @transform_11, window_bounds = array<i64: 8, 1>}, {pipeline_mode = #tpu.pipeline_mode<synchronous>, transform_indices = @transform_12, window_bounds = array<i64: 8, 1>}, {pipeline_mode = #tpu.pipeline_mode<synchronous>, transform_indices = @transform_13, window_bounds = array<i64: 1, 1>}, {transform_indices = @transform_14, window_bounds = array<i64: 1, 4, 256>}, {transform_indices = @transform_15, window_bounds = array<i64: 1, 32, 256>}]} {
    %c0 = arith.constant 0 : index
    %c0_0 = arith.constant 0 : index
    %c0_1 = arith.constant 0 : index
    %0 = vector.load %arg2[%c0, %c0_0, %c0_1] : memref<1x32x256xf32, #tpu.memory_space<vmem>>, vector<1x32x256xf32>
    %1 = vector.shape_cast %0 : vector<1x32x256xf32> to vector<32x256xf32>
    %c0_2 = arith.constant 0 : index
    %c0_3 = arith.constant 0 : index
    %2 = vector.load %arg3[%c0_2, %c0_3] : memref<64x32xbf16, #tpu.memory_space<vmem>>, vector<64x32xbf16>
    %3 = arith.truncf %1 : vector<32x256xf32> to vector<32x256xbf16>
    %cst = arith.constant dense<0.000000e+00> : vector<64x256xf32>
    %4 = tpu.matmul %2, %3, %cst {dimension_numbers = #tpu.dot_dimension_numbers<[1], [0], [0], [1], [0, 0, 1, 1], [], []>} : vector<64x32xbf16>, vector<32x256xbf16>, vector<64x256xf32> -> vector<64x256xf32>
    %c0_4 = arith.constant 0 : index
    %c0_5 = arith.constant 0 : index
    %5 = vector.load %arg4[%c0_4, %c0_5] : memref<64x1xf32, #tpu.memory_space<vmem>>, vector<64x1xf32>
    %6 = vector.broadcast %5 : vector<64x1xf32> to vector<64x256xf32>
    %7 = arith.addf %4, %6 : vector<64x256xf32>
    %cst_6 = arith.constant 1.000000e-01 : f32
    %8 = vector.broadcast %cst_6 : f32 to vector<64x256xf32>
    %9 = arith.mulf %8, %7 : vector<64x256xf32>
    %10 = arith.maximumf %7, %9 : vector<64x256xf32>
    %c0_7 = arith.constant 0 : index
    %c0_8 = arith.constant 0 : index
    %11 = vector.load %arg5[%c0_7, %c0_8] : memref<32x64xbf16, #tpu.memory_space<vmem>>, vector<32x64xbf16>
    %12 = arith.truncf %10 : vector<64x256xf32> to vector<64x256xbf16>
    %cst_9 = arith.constant dense<0.000000e+00> : vector<32x256xf32>
    %13 = tpu.matmul %11, %12, %cst_9 {dimension_numbers = #tpu.dot_dimension_numbers<[1], [0], [0], [1], [0, 0, 1, 1], [], []>} : vector<32x64xbf16>, vector<64x256xbf16>, vector<32x256xf32> -> vector<32x256xf32>
    %c0_10 = arith.constant 0 : index
    %c0_11 = arith.constant 0 : index
    %14 = vector.load %arg6[%c0_10, %c0_11] : memref<32x1xf32, #tpu.memory_space<vmem>>, vector<32x1xf32>
    %15 = vector.broadcast %14 : vector<32x1xf32> to vector<32x256xf32>
    %16 = arith.addf %13, %15 : vector<32x256xf32>
    %cst_12 = arith.constant 1.000000e-01 : f32
    %17 = vector.broadcast %cst_12 : f32 to vector<32x256xf32>
    %18 = arith.mulf %17, %16 : vector<32x256xf32>
    %19 = arith.maximumf %16, %18 : vector<32x256xf32>
    %c0_13 = arith.constant 0 : index
    %c0_14 = arith.constant 0 : index
    %20 = vector.load %arg7[%c0_13, %c0_14] : memref<4x32xbf16, #tpu.memory_space<vmem>>, vector<4x32xbf16>
    %21 = arith.truncf %19 : vector<32x256xf32> to vector<32x256xbf16>
    %cst_15 = arith.constant dense<0.000000e+00> : vector<4x256xf32>
    %22 = tpu.matmul %20, %21, %cst_15 {dimension_numbers = #tpu.dot_dimension_numbers<[1], [0], [0], [1], [0, 0, 1, 1], [], []>} : vector<4x32xbf16>, vector<32x256xbf16>, vector<4x256xf32> -> vector<4x256xf32>
    %c0_16 = arith.constant 0 : index
    %c0_17 = arith.constant 0 : index
    %23 = vector.load %arg8[%c0_16, %c0_17] : memref<4x1xf32, #tpu.memory_space<vmem>>, vector<4x1xf32>
    %24 = vector.broadcast %23 : vector<4x1xf32> to vector<4x256xf32>
    %25 = arith.addf %22, %24 : vector<4x256xf32>
    %cst_18 = arith.constant dense<0xFF800000> : vector<256xf32>
    %26 = vector.multi_reduction <maximumf>, %25, %cst_18 [0] : vector<4x256xf32> to vector<256xf32>
    %27 = vector.shape_cast %26 : vector<256xf32> to vector<1x256xf32>
    %28 = vector.broadcast %27 : vector<1x256xf32> to vector<4x256xf32>
    %29 = arith.subf %25, %28 : vector<4x256xf32>
    %30 = math.exp %29 : vector<4x256xf32>
    %cst_19 = arith.constant dense<0.000000e+00> : vector<256xf32>
    %31 = vector.multi_reduction <add>, %30, %cst_19 [0] : vector<4x256xf32> to vector<256xf32>
    %32 = vector.shape_cast %31 : vector<256xf32> to vector<1x256xf32>
    %33 = vector.broadcast %32 : vector<1x256xf32> to vector<4x256xf32>
    %34 = arith.divf %30, %33 : vector<4x256xf32>
    %c0_20 = arith.constant 0 : index
    %c0_21 = arith.constant 0 : index
    %c0_22 = arith.constant 0 : index
    %35 = vector.load %arg16[%c0_20, %c0_21, %c0_22] : memref<1x4x256xf32, #tpu.memory_space<vmem>>, vector<1x4x256xf32>
    %36 = vector.shape_cast %35 : vector<1x4x256xf32> to vector<4x256xf32>
    %37 = vector.shape_cast %34 : vector<4x256xf32> to vector<1x4x256xf32>
    tpu.vector_store %arg16[%c0_20, %c0_21, %c0_22], %37 {strides = array<i32>} : memref<1x4x256xf32, #tpu.memory_space<vmem>>, vector<1x4x256xf32>,
    %c0_23 = arith.constant 0 : index
    %c0_24 = arith.constant 0 : index
    %38 = vector.load %arg9[%c0_23, %c0_24] : memref<32x4xbf16, #tpu.memory_space<vmem>>, vector<32x4xbf16>
    %39 = arith.truncf %34 : vector<4x256xf32> to vector<4x256xbf16>
    %cst_25 = arith.constant dense<0.000000e+00> : vector<32x256xf32>
    %40 = tpu.matmul %38, %39, %cst_25 {dimension_numbers = #tpu.dot_dimension_numbers<[1], [0], [0], [1], [0, 0, 1, 1], [], []>} : vector<32x4xbf16>, vector<4x256xbf16>, vector<32x256xf32> -> vector<32x256xf32>
    %41 = arith.mulf %40, %40 : vector<32x256xf32>
    %c0_26 = arith.constant 0 : index
    %c0_27 = arith.constant 0 : index
    %42 = vector.load %arg10[%c0_26, %c0_27] : memref<16x32xbf16, #tpu.memory_space<vmem>>, vector<16x32xbf16>
    %43 = arith.truncf %40 : vector<32x256xf32> to vector<32x256xbf16>
    %cst_28 = arith.constant dense<0.000000e+00> : vector<16x256xf32>
    %44 = tpu.matmul %42, %43, %cst_28 {dimension_numbers = #tpu.dot_dimension_numbers<[1], [0], [0], [1], [0, 0, 1, 1], [], []>} : vector<16x32xbf16>, vector<32x256xbf16>, vector<16x256xf32> -> vector<16x256xf32>
    %c0_29 = arith.constant 0 : index
    %c0_30 = arith.constant 0 : index
    %45 = vector.load %arg11[%c0_29, %c0_30] : memref<16x1xf32, #tpu.memory_space<vmem>>, vector<16x1xf32>
    %46 = vector.broadcast %45 : vector<16x1xf32> to vector<16x256xf32>
    %47 = arith.addf %44, %46 : vector<16x256xf32>
    %cst_31 = arith.constant 1.000000e-01 : f32
    %48 = vector.broadcast %cst_31 : f32 to vector<16x256xf32>
    %49 = arith.mulf %48, %47 : vector<16x256xf32>
    %50 = arith.maximumf %47, %49 : vector<16x256xf32>
    %c0_32 = arith.constant 0 : index
    %c0_33 = arith.constant 0 : index
    %51 = vector.load %arg12[%c0_32, %c0_33] : memref<8x16xbf16, #tpu.memory_space<vmem>>, vector<8x16xbf16>
    %52 = arith.truncf %50 : vector<16x256xf32> to vector<16x256xbf16>
    %cst_34 = arith.constant dense<0.000000e+00> : vector<8x256xf32>
    %53 = tpu.matmul %51, %52, %cst_34 {dimension_numbers = #tpu.dot_dimension_numbers<[1], [0], [0], [1], [0, 0, 1, 1], [], []>} : vector<8x16xbf16>, vector<16x256xbf16>, vector<8x256xf32> -> vector<8x256xf32>
    %c0_35 = arith.constant 0 : index
    %c0_36 = arith.constant 0 : index
    %54 = vector.load %arg13[%c0_35, %c0_36] : memref<8x1xf32, #tpu.memory_space<vmem>>, vector<8x1xf32>
    %55 = vector.broadcast %54 : vector<8x1xf32> to vector<8x256xf32>
    %56 = arith.addf %53, %55 : vector<8x256xf32>
    %cst_37 = arith.constant 1.000000e-01 : f32
    %57 = vector.broadcast %cst_37 : f32 to vector<8x256xf32>
    %58 = arith.mulf %57, %56 : vector<8x256xf32>
    %59 = arith.maximumf %56, %58 : vector<8x256xf32>
    %c0_38 = arith.constant 0 : index
    %c0_39 = arith.constant 0 : index
    %60 = vector.load %arg10[%c0_38, %c0_39] : memref<16x32xbf16, #tpu.memory_space<vmem>>, vector<16x32xbf16>
    %61 = arith.truncf %41 : vector<32x256xf32> to vector<32x256xbf16>
    %cst_40 = arith.constant dense<0.000000e+00> : vector<16x256xf32>
    %62 = tpu.matmul %60, %61, %cst_40 {dimension_numbers = #tpu.dot_dimension_numbers<[1], [0], [0], [1], [0, 0, 1, 1], [], []>} : vector<16x32xbf16>, vector<32x256xbf16>, vector<16x256xf32> -> vector<16x256xf32>
    %c0_41 = arith.constant 0 : index
    %c0_42 = arith.constant 0 : index
    %63 = vector.load %arg11[%c0_41, %c0_42] : memref<16x1xf32, #tpu.memory_space<vmem>>, vector<16x1xf32>
    %64 = vector.broadcast %63 : vector<16x1xf32> to vector<16x256xf32>
    %65 = arith.addf %62, %64 : vector<16x256xf32>
    %cst_43 = arith.constant 1.000000e-01 : f32
    %66 = vector.broadcast %cst_43 : f32 to vector<16x256xf32>
    %67 = arith.mulf %66, %65 : vector<16x256xf32>
    %68 = arith.maximumf %65, %67 : vector<16x256xf32>
    %c0_44 = arith.constant 0 : index
    %c0_45 = arith.constant 0 : index
    %69 = vector.load %arg12[%c0_44, %c0_45] : memref<8x16xbf16, #tpu.memory_space<vmem>>, vector<8x16xbf16>
    %70 = arith.truncf %68 : vector<16x256xf32> to vector<16x256xbf16>
    %cst_46 = arith.constant dense<0.000000e+00> : vector<8x256xf32>
    %71 = tpu.matmul %69, %70, %cst_46 {dimension_numbers = #tpu.dot_dimension_numbers<[1], [0], [0], [1], [0, 0, 1, 1], [], []>} : vector<8x16xbf16>, vector<16x256xbf16>, vector<8x256xf32> -> vector<8x256xf32>
    %c0_47 = arith.constant 0 : index
    %c0_48 = arith.constant 0 : index
    %72 = vector.load %arg13[%c0_47, %c0_48] : memref<8x1xf32, #tpu.memory_space<vmem>>, vector<8x1xf32>
    %73 = vector.broadcast %72 : vector<8x1xf32> to vector<8x256xf32>
    %74 = arith.addf %71, %73 : vector<8x256xf32>
    %cst_49 = arith.constant 1.000000e-01 : f32
    %75 = vector.broadcast %cst_49 : f32 to vector<8x256xf32>
    %76 = arith.mulf %75, %74 : vector<8x256xf32>
    %77 = arith.maximumf %74, %76 : vector<8x256xf32>
    %78 = arith.subf %59, %77 : vector<8x256xf32>
    %79 = math.absf %78 : vector<8x256xf32>
    %c0_50 = arith.constant 0 : index
    %c0_51 = arith.constant 0 : index
    %80 = vector.load %arg14[%c0_50, %c0_51] : memref<8x1xf32, #tpu.memory_space<vmem>>, vector<8x1xf32>
    %81 = vector.broadcast %80 : vector<8x1xf32> to vector<8x256xf32>
    %82 = arith.mulf %81, %79 : vector<8x256xf32>
    %cst_52 = arith.constant dense<0.000000e+00> : vector<256xf32>
    %83 = vector.multi_reduction <add>, %82, %cst_52 [0] : vector<8x256xf32> to vector<256xf32>
    %84 = vector.shape_cast %83 : vector<256xf32> to vector<1x256xf32>
    %c0_53 = arith.constant 0 : index
    %c0_54 = arith.constant 0 : index
    %85 = vector.load %arg15[%c0_53, %c0_54] : memref<1x1xf32, #tpu.memory_space<vmem>>, vector<1x1xf32>
    %86 = vector.broadcast %85 : vector<1x1xf32> to vector<1x256xf32>
    %87 = arith.addf %84, %86 : vector<1x256xf32>
    %88 = arith.negf %87 : vector<1x256xf32>
    %89 = math.exp %88 : vector<1x256xf32>
    %cst_55 = arith.constant 1.000000e+00 : f32
    %90 = vector.broadcast %cst_55 : f32 to vector<1x256xf32>
    %91 = arith.addf %90, %89 : vector<1x256xf32>
    %92 = arith.divf %90, %91 : vector<1x256xf32>
    %93 = vector.broadcast %92 : vector<1x256xf32> to vector<32x256xf32>
    %94 = arith.mulf %93, %41 : vector<32x256xf32>
    %95 = arith.addf %40, %94 : vector<32x256xf32>
    %c0_56 = arith.constant 0 : index
    %c0_57 = arith.constant 0 : index
    %c0_58 = arith.constant 0 : index
    %96 = vector.load %arg17[%c0_56, %c0_57, %c0_58] : memref<1x32x256xf32, #tpu.memory_space<vmem>>, vector<1x32x256xf32>
    %97 = vector.shape_cast %96 : vector<1x32x256xf32> to vector<32x256xf32>
    %98 = vector.shape_cast %95 : vector<32x256xf32> to vector<1x32x256xf32>
    tpu.vector_store %arg17[%c0_56, %c0_57, %c0_58], %98 {strides = array<i32>} : memref<1x32x256xf32, #tpu.memory_space<vmem>>, vector<1x32x256xf32>,
    return
  }
  func.func @transform_0(%arg0: i32, %arg1: i32) -> (i32, i32, i32) {
    %c0_i32 = arith.constant 0 : i32
    %c0_i32_0 = arith.constant 0 : i32
    return %arg1, %c0_i32, %arg0 : i32, i32, i32
  }
  func.func @transform_1(%arg0: i32, %arg1: i32) -> (i32, i32) {
    %c0_i32 = arith.constant 0 : i32
    %c0_i32_0 = arith.constant 0 : i32
    %c0_i32_1 = arith.constant 0 : i32
    return %c0_i32, %c0_i32_0 : i32, i32
  }
  func.func @transform_2(%arg0: i32, %arg1: i32) -> (i32, i32) {
    %c0_i32 = arith.constant 0 : i32
    %c0_i32_0 = arith.constant 0 : i32
    %c0_i32_1 = arith.constant 0 : i32
    return %c0_i32, %c0_i32_0 : i32, i32
  }
  func.func @transform_3(%arg0: i32, %arg1: i32) -> (i32, i32) {
    %c0_i32 = arith.constant 0 : i32
    %c0_i32_0 = arith.constant 0 : i32
    %c0_i32_1 = arith.constant 0 : i32
    return %c0_i32, %c0_i32_0 : i32, i32
  }
  func.func @transform_4(%arg0: i32, %arg1: i32) -> (i32, i32) {
    %c0_i32 = arith.constant 0 : i32
    %c0_i32_0 = arith.constant 0 : i32
    %c0_i32_1 = arith.constant 0 : i32
    return %c0_i32, %c0_i32_0 : i32, i32
  }
  func.func @transform_5(%arg0: i32, %arg1: i32) -> (i32, i32) {
    %c0_i32 = arith.constant 0 : i32
    %c0_i32_0 = arith.constant 0 : i32
    %c0_i32_1 = arith.constant 0 : i32
    return %c0_i32, %c0_i32_0 : i32, i32
  }
  func.func @transform_6(%arg0: i32, %arg1: i32) -> (i32, i32) {
    %c0_i32 = arith.constant 0 : i32
    %c0_i32_0 = arith.constant 0 : i32
    %c0_i32_1 = arith.constant 0 : i32
    return %c0_i32, %c0_i32_0 : i32, i32
  }
  func.func @transform_7(%arg0: i32, %arg1: i32) -> (i32, i32) {
    %c0_i32 = arith.constant 0 : i32
    %c0_i32_0 = arith.constant 0 : i32
    %c0_i32_1 = arith.constant 0 : i32
    return %c0_i32, %c0_i32_0 : i32, i32
  }
  func.func @transform_8(%arg0: i32, %arg1: i32) -> (i32, i32) {
    %c0_i32 = arith.constant 0 : i32
    %c0_i32_0 = arith.constant 0 : i32
    %c0_i32_1 = arith.constant 0 : i32
    return %c0_i32, %c0_i32_0 : i32, i32
  }
  func.func @transform_9(%arg0: i32, %arg1: i32) -> (i32, i32) {
    %c0_i32 = arith.constant 0 : i32
    %c0_i32_0 = arith.constant 0 : i32
    %c0_i32_1 = arith.constant 0 : i32
    return %c0_i32, %c0_i32_0 : i32, i32
  }
  func.func @transform_10(%arg0: i32, %arg1: i32) -> (i32, i32) {
    %c0_i32 = arith.constant 0 : i32
    %c0_i32_0 = arith.constant 0 : i32
    %c0_i32_1 = arith.constant 0 : i32
    return %c0_i32, %c0_i32_0 : i32, i32
  }
  func.func @transform_11(%arg0: i32, %arg1: i32) -> (i32, i32) {
    %c0_i32 = arith.constant 0 : i32
    %c0_i32_0 = arith.constant 0 : i32
    %c0_i32_1 = arith.constant 0 : i32
    return %c0_i32, %c0_i32_0 : i32, i32
  }
  func.func @transform_12(%arg0: i32, %arg1: i32) -> (i32, i32) {
    %c0_i32 = arith.constant 0 : i32
    %c0_i32_0 = arith.constant 0 : i32
    %c0_i32_1 = arith.constant 0 : i32
    return %c0_i32, %c0_i32_0 : i32, i32
  }
  func.func @transform_13(%arg0: i32, %arg1: i32) -> (i32, i32) {
    %c0_i32 = arith.constant 0 : i32
    %c0_i32_0 = arith.constant 0 : i32
    %c0_i32_1 = arith.constant 0 : i32
    return %c0_i32, %c0_i32_0 : i32, i32
  }
  func.func @transform_14(%arg0: i32, %arg1: i32) -> (i32, i32, i32) {
    %c0_i32 = arith.constant 0 : i32
    %c0_i32_0 = arith.constant 0 : i32
    return %arg1, %c0_i32, %arg0 : i32, i32, i32
  }
  func.func @transform_15(%arg0: i32, %arg1: i32) -> (i32, i32, i32) {
    %c0_i32 = arith.constant 0 : i32
    %c0_i32_0 = arith.constant 0 : i32
    return %arg1, %c0_i32, %arg0 : i32, i32, i32
  }
}

</mosaic_0001>

<bundles_post_ra>
// kernel: globalmodel_forward.1
= control target key start
LH: loop header
LB: loop body
LE: loop exit
PB: predicated region body
PF: predicated region fallthrough
CT: control target
= control target key end

     0   :  { %s1696_s20 = smov 0   ;;  %s1698_s21 = smov 0   ;;  %s1927_s0 = inlined_call_operand.vmem [shape: f32[2,32,256], index: 0, kind: input, shape index: {}]   ;;  %s1928_s1 = inlined_call_operand.vmem [shape: bf16[64,32], index: 1, kind: input, shape index: {}]   ;;  %s1929_s2 = inlined_call_operand.vmem [shape: f32[64,1], index: 2, kind: input, shape index: {}]   ;;  %s1930_s3 = inlined_call_operand.vmem [shape: bf16[32,64], index: 3, kind: input, shape index: {}]   ;;  %s1931_s4 = inlined_call_operand.vmem [shape: f32[32,1], index: 4, kind: input, shape index: {}]   ;;  %s1932_s5 = inlined_call_operand.vmem [shape: bf16[4,32], index: 5, kind: input, shape index: {}]   ;;  %s1933_s6 = inlined_call_operand.vmem [shape: f32[4,1], index: 6, kind: input, shape index: {}]   ;;  %s1934_s7 = inlined_call_operand.vmem [shape: bf16[32,4], index: 7, kind: input, shape index: {}]   ;;  %s1935_s8 = inlined_call_operand.vmem [shape: bf16[16,32], index: 8, kind: input, shape index: {}]   ;;  %s1936_s9 = inlined_call_operand.vmem [shape: f32[16,1], index: 9, kind: input, shape index: {}]   ;;  %s1937_s10 = inlined_call_operand.vmem [shape: bf16[8,16], index: 10, kind: input, shape index: {}]   ;;  %s1938_s11 = inlined_call_operand.vmem [shape: f32[8,1], index: 11, kind: input, shape index: {}]   ;;  %s1939_s12 = inlined_call_operand.vmem [shape: f32[8,1], index: 12, kind: input, shape index: {}]   ;;  %s1940_s13 = inlined_call_operand.<no memory space> [shape: f32[1,1], index: 13, kind: input, shape index: {}]   ;;  %s1941_s14 = inlined_call_operand.vmem [shape: f32[2,4,256], index: 14, kind: output, shape index: {0}]   ;;  %s1942_s15 = inlined_call_operand.vmem [shape: f32[2,32,256], index: 15, kind: output, shape index: {1}]  }
   0x1   :  { %v21_v0 = vstv %s1940_s13  ;;  %s1700_s22 = smov 0  }
   0x2   :  { %22 = vst [vmem:[#allocation2] sm:$0x1] %v21_v0 }
   0x3 LB: > { %s37_s13 = sadd.s32 1, %s1606_s21  ;;  %p1459_p0 = scmp.ge.s32.totalorder %s1610_s22, 1  ;;  %s1610_s22 = sphi %s1700_s22, %s28_s22   ;;  %s1606_s21 = sphi %s1698_s21, %s1944_s21   ;;  %s1602_s20 = sphi %s1696_s20, %s1943_s20  }
   0x4   : > { %p38_p1 = scmp.ge.s32.totalorder %s37_s13, 2  ;;  %p465_p2 = scmp.lt.s32.totalorder %s1610_s22, 3 }
   0x6   : > { %s1946_s13 = smov (%p38_p1, %s37_s13), 0  ;;  %p466_p3 = pnand %p1459_p0, %p465_p2 }
   0x7   : > { %p531_p4 = scmp.lt.s32.totalorder (!%p466_p3), %s1602_s20, 1 }
   0x8   : > { %469 = sbr.rel (%p466_p3) target bundleno = 1117 (0x45d), region = 76 }
   0xd   : > { %v587_v1 = vld [vmem:[%s1929_s2 + $0x30] sm:$0xff]  ;;  %v1612_v2 = vmov 0   ;;  %v585_v3 = vld [vmem:[%s1929_s2 + $0x20] sm:$0xff]  ;;  %s1948_s20 = smov (!%p531_p4, %s1602_s20), 1  ;;  %v588_v4 = vld [vmem:[%s1929_s2 + $0x38] sm:$0xff]  ;;  %vm649_vm0 = vcmask 261120  }
   0xe   : > { %1569 = vset.pattern.permute.xlu0 %v1612_v2  ;;  %1570 = vset.pattern.permute.xlu1 %v1612_v2  ;;  %s1532_s27 = sshll.u32 %s1948_s20, 6  ;;  %v586_v15 = vld [vmem:[%s1929_s2 + $0x28] sm:$0xff]  ;;  %v1535_v18 = vld [vmem:[%s1928_s1] sm:$0xff]  ;;  %v767_v21 = vld [vmem:[%s1931_s4 + $0x18] sm:$0xff]  ;;  %vm798_vm1 = vcmask 523264   ;;  %vm899_vm2 = vcmask 1043456  }
   0xf   : > { %621 = vperm.xlu0 %1569, %v587_v1   ;;  %611 = vperm.xlu1 %1570, %v585_v3   ;;  %s538_s30 = scalar_lea.vmem %s1927_s0, %s1532_s27  ;;  %v581_v19 = vld [vmem:[%s1929_s2] sm:$0xff]  ;;  %v582_v20 = vld [vmem:[%s1929_s2 + $0x8] sm:$0xff]  ;;  %v583_v24 = vld [vmem:[%s1929_s2 + $0x10] sm:$0xff]  ;;  %s1533_s16 = sshll.u32 %s1948_s20, 3  ;;  %vm993_vm11 = vcmask 1041408   ;;  %vm986_vm12 = vcmask 31744  }
  0x10   : > { %1571 = vset.pattern.permute.xlu2 %v1612_v2  ;;  %v565_v5 = vld [vmem:[%s538_s30 + $0x20] sm:$0xff]  ;;  %v567_v6 = vld [vmem:[%s538_s30 + $0x30] sm:$0xff]  ;;  %v566_v7 = vld [vmem:[%s538_s30 + $0x28] sm:$0xff]  ;;  %s548_s19 = scalar_lea.vmem %s1941_s14, %s1533_s16  ;;  %vm1117_vm13 = vcmask 130048  }
  0x11   : > { %v579_v8 = vpack.c.bf16 %v567_v6, %v565_v5  ;;  %v568_v9 = vld [vmem:[%s538_s30 + $0x38] sm:$0xff]  ;;  %v561_v10 = vld [vmem:[%s538_s30] sm:$0xff]  ;;  %v563_v11 = vld [vmem:[%s538_s30 + $0x10] sm:$0xff]  ;;  %601 = vperm.xlu2 %1571, %v583_v24  }
  0x12   : > { %v580_v12 = vpack.c.bf16 %v568_v9, %v566_v7  ;;  %v562_v13 = vld [vmem:[%s538_s30 + $0x8] sm:$0xff]  ;;  %v564_v14 = vld [vmem:[%s538_s30 + $0x18] sm:$0xff]  ;;  %v577_v16 = vpack.c.bf16 %v563_v11, %v561_v10  ;;  %v764_v22 = vld [vmem:[%s1931_s4] sm:$0xff] }
  0x13   : > { %668 = vmatpush.bf16.msra.mxu0 %v579_v8  ;;  %v578_v17 = vpack.c.bf16 %v564_v14, %v562_v13  ;;  %v1536_v23 = vld [vmem:[%s1928_s1 + $0x8] sm:$0xff]  ;;  %v864_v25 = vld [vmem:[%s1933_s6] sm:$0xf]  ;;  %v584_v27 = vld [vmem:[%s1929_s2 + $0x18] sm:$0xff] }
  0x14   : > { %697 = vmatpush.bf16.msra.mxu1 %v580_v12  ;;  %v1052_v26 = vld [vmem:[%s1936_s9] sm:$0xff]  ;;  %v1537_v30 = vld [vmem:[%s1928_s1 + $0x10] sm:$0xff]  ;;  %v765_v32 = vld [vmem:[%s1931_s4 + $0x8] sm:$0xff] }
  0x15   : > { %v1111_v28 = vld [vmem:[%s1938_s11] sm:$0xff]  ;;  %v766_v31 = vld [vmem:[%s1931_s4 + $0x10] sm:$0xff]  ;;  %v1538_v33 = vld [vmem:[%s1928_s1 + $0x18] sm:$0xff] }
  0x16   : > { %v1227_v29 = vld [vmem:[%s1939_s12] sm:$0xff]  ;;  %v1053_v34 = vld [vmem:[%s1936_s9 + $0x8] sm:$0xff] }
  0x17   : > { %626 = vperm.xlu0 %1569, %v588_v4   ;;  %616 = vperm.xlu1 %1570, %v586_v15   ;;  %v1247_v35 = vld [vmem:[#allocation2] sm:$0x1] }
  0x18   : > { %669 = vmatpush.bf16.msra.mxu0 %v577_v16  ;;  %698 = vmatpush.bf16.msra.mxu1 %v578_v17 }
  0x19   : > { %606 = vperm.xlu2 %1571, %v584_v27  }
  0x1b   : > { %1482 = vmatmul.msk.bf16.vlgmr.msra.gmra.mxu0 %vm649_vm0, %v1535_v18  ;;  %1486 = vmatmul.msk.bf16.vlgmr.msra.gmra.mxu1 %vm649_vm0, %v1535_v18 }
  0x1f   : > { %591 = vperm.xlu0 %1569, %v581_v19   ;;  %596 = vperm.xlu1 %1570, %v582_v20  }
  0x21   : > { %780 = vperm.xlu2 %1571, %v766_v31  }
  0x27   : > { %785 = vperm.xlu0 %1569, %v767_v21   ;;  %770 = vperm.xlu1 %1570, %v764_v22  }
  0x29   : > { %775 = vperm.xlu2 %1571, %v765_v32  }
  0x2b   : > { %1483 = vmatmul.msk.bf16.gmra.mxu0 %vm649_vm0, %v1536_v23  ;;  %1487 = vmatmul.msk.bf16.gmra.mxu1 %vm649_vm0, %v1536_v23 }
  0x2f   : > { %867 = vperm.xlu0 %1569, %v864_v25   ;;  %1056 = vperm.xlu1 %1570, %v1052_v26  }
  0x31   : > { %1061 = vperm.xlu2 %1571, %v1053_v34  }
  0x37   : > { %1114 = vperm.xlu0 %1569, %v1111_v28   ;;  %1230 = vperm.xlu1 %1570, %v1227_v29  }
  0x39   : > { %1250 = vperm.xlu2 %1571, %v1247_v35  }
  0x3b   : > { %1484 = vmatmul.msk.bf16.gmra.mxu0 %vm649_vm0, %v1537_v30  ;;  %1488 = vmatmul.msk.bf16.gmra.mxu1 %vm649_vm0, %v1537_v30 }
  0x4b   : > { %1485 = vmatmul.msk.bf16.gmra.mxu0 %vm649_vm0, %v1538_v33  ;;  %1489 = vmatmul.msk.bf16.gmra.mxu1 %vm649_vm0, %v1538_v33 }
  0x6b   : > { %v602_v50 = vpop.permute.xlu2 %601 }
  0x73   : > { %v607_v58 = vpop.permute.xlu2 %606 }
  0x81   : > { %v612_v46 = vpop.permute.xlu1 %611  ;;  %v622_v49 = vpop.permute.xlu0 %621 }
  0x89   : > { %v617_v53 = vpop.permute.xlu1 %616  ;;  %v627_v54 = vpop.permute.xlu0 %626 }
  0x91   : > { %v597_v7 = vpop.permute.xlu1 %596  ;;  %v592_v15 = vpop.permute.xlu0 %591 }
  0x98   : > { %v671_v36 = vpop.f32.mrf.mxu0  ;;  %v700_v37 = vpop.f32.mrf.mxu1 }
  0x99   : > { %v672_v28 = vadd.f32 %v671_v36, %v592_v15  ;;  %v701_v31 = vadd.f32 %v700_v37, %v592_v15 }
  0xa0   : > { %v673_v38 = vpop.f32.mrf.mxu0  ;;  %v702_v39 = vpop.f32.mrf.mxu1 }
  0xa1   : > { %v674_v20 = vadd.f32 %v673_v38, %v597_v7  ;;  %v703_v24 = vadd.f32 %v702_v39, %v597_v7  ;;  %v721_v39 = vmul.f32 0.1, %v701_v31 }
  0xa3   : > { %v722_v34 = vmul.f32 0.1, %v674_v20 }
  0xa5   : > { %v738_v36 = vmax.f32 %v674_v20, %v722_v34 }
  0xa8   : > { %v676_v40 = vpop.f32.mrf.mxu0  ;;  %v705_v41 = vpop.f32.mrf.mxu1 }
  0xa9   : > { %v677_v11 = vadd.f32 %v676_v40, %v602_v50  ;;  %v706_v16 = vadd.f32 %v705_v41, %v602_v50  ;;  %v723_v41 = vmul.f32 0.1, %v703_v24 }
  0xab   : > { %v724_v29 = vmul.f32 0.1, %v677_v11  ;;  %v725_v32 = vmul.f32 0.1, %v706_v16 }
  0xb0   : > { %v678_v42 = vpop.f32.mrf.mxu0  ;;  %v707_v43 = vpop.f32.mrf.mxu1 }
  0xb1   : > { %v679_v4 = vadd.f32 %v678_v42, %v607_v58  ;;  %v708_v8 = vadd.f32 %v707_v43, %v607_v58  ;;  %v720_v43 = vmul.f32 0.1, %v672_v28  ;;  %v781_v58 = vpop.permute.xlu2 %780 }
  0xb3   : > { %v726_v21 = vmul.f32 0.1, %v679_v4  ;;  %v727_v25 = vmul.f32 0.1, %v708_v8  ;;  %v736_v37 = vmax.f32 %v672_v28, %v720_v43 }
  0xb5   : > { %v742_v35 = vmax.f32 %v679_v4, %v726_v21  ;;  %v743_v38 = vmax.f32 %v708_v8, %v727_v25  ;;  %v756_v50 = vpack.c.bf16 %v738_v36, %v736_v37 }
  0xb8   : > { %v681_v44 = vpop.f32.mrf.mxu0  ;;  %v710_v45 = vpop.f32.mrf.mxu1 }
  0xb9   : > { %v682_v61 = vadd.f32 %v681_v44, %v612_v46  ;;  %v711_v1 = vadd.f32 %v710_v45, %v612_v46  ;;  %v740_v44 = vmax.f32 %v677_v11, %v724_v29  ;;  %v741_v45 = vmax.f32 %v706_v16, %v725_v32 }
  0xbb   : > { %v728_v12 = vmul.f32 0.1, %v682_v61  ;;  %v729_v17 = vmul.f32 0.1, %v711_v1  ;;  %v758_v46 = vpack.c.bf16 %v742_v35, %v740_v44 }
  0xbd   : > { %v744_v30 = vmax.f32 %v682_v61, %v728_v12  ;;  %v745_v33 = vmax.f32 %v711_v1, %v729_v17 }
  0xc0   : > { %v683_v47 = vpop.f32.mrf.mxu0  ;;  %v712_v48 = vpop.f32.mrf.mxu1 }
  0xc1   : > { %v684_v57 = vadd.f32 %v683_v47, %v617_v53  ;;  %v713_v59 = vadd.f32 %v712_v48, %v617_v53  ;;  %v739_v47 = vmax.f32 %v703_v24, %v723_v41  ;;  %v759_v48 = vpack.c.bf16 %v743_v38, %v741_v45  ;;  %v1540_v53 = vld [vmem:[%s1930_s3 + $0x8] sm:$0xff] }
  0xc3   : > { %v730_v5 = vmul.f32 0.1, %v684_v57  ;;  %v731_v9 = vmul.f32 0.1, %v713_v59 }
  0xc5   : > { %v746_v22 = vmax.f32 %v684_v57, %v730_v5  ;;  %v747_v26 = vmax.f32 %v713_v59, %v731_v9 }
  0xc7   : > { %v760_v40 = vpack.c.bf16 %v746_v22, %v744_v30  ;;  %v761_v42 = vpack.c.bf16 %v747_v26, %v745_v33  ;;  %v859_v30 = vld [vmem:[%s1932_s5] sm:$0x3] }
  0xc8   : > { %v686_v51 = vpop.f32.mrf.mxu0  ;;  %v715_v52 = vpop.f32.mrf.mxu1 }
  0xc9   : > { %v687_v55 = vadd.f32 %v686_v51, %v622_v49  ;;  %v716_v56 = vadd.f32 %v715_v52, %v622_v49  ;;  %v737_v49 = vmax.f32 %v701_v31, %v721_v39  ;;  %v1539_v52 = vld [vmem:[%s1930_s3] sm:$0xff] }
  0xcb   : > { %v732_v62 = vmul.f32 0.1, %v687_v55  ;;  %v733_v2 = vmul.f32 0.1, %v716_v56  ;;  %v757_v51 = vpack.c.bf16 %v739_v47, %v737_v49 }
  0xcd   : > { %v748_v13 = vmax.f32 %v687_v55, %v732_v62  ;;  %v749_v18 = vmax.f32 %v716_v56, %v733_v2  ;;  %v776_v62 = vpop.permute.xlu2 %775  ;;  %v771_v2 = vpop.permute.xlu1 %770 }
  0xd0   : > { %v688_v60 = vpop.f32.mrf.mxu0  ;;  %v717_v0 = vpop.f32.mrf.mxu1 }
  0xd1   : > { %v689_v63 = vadd.f32 %v688_v60, %v627_v54  ;;  %v718_v3 = vadd.f32 %v717_v0, %v627_v54  ;;  %v786_v0 = vpop.permute.xlu0 %785 }
  0xd3   : > { %v734_v6 = vmul.f32 0.1, %v689_v63  ;;  %v735_v10 = vmul.f32 0.1, %v718_v3 }
  0xd5   : > { %v750_v14 = vmax.f32 %v689_v63, %v734_v6  ;;  %v751_v19 = vmax.f32 %v718_v3, %v735_v10 }
  0xd7   : > { %v762_v23 = vpack.c.bf16 %v750_v14, %v748_v13  ;;  %v763_v27 = vpack.c.bf16 %v751_v19, %v749_v18 }
  0xd9   : > { %809 = vmatpush.bf16.msra.mxu2 %v762_v23  ;;  %828 = vmatpush.bf16.msra.mxu3 %v763_v27  ;;  %v868_v31 = vpop.permute.xlu0 %867 }
  0xdd   : > { %810 = vmatpush.bf16.msra.mxu2 %v760_v40  ;;  %829 = vmatpush.bf16.msra.mxu3 %v761_v42 }
  0xe1   : > { %811 = vmatpush.bf16.msra.mxu2 %v758_v46  ;;  %830 = vmatpush.bf16.msra.mxu3 %v759_v48 }
  0xe5   : > { %812 = vmatpush.bf16.msra.mxu2 %v756_v50  ;;  %831 = vmatpush.bf16.msra.mxu3 %v757_v51 }
  0xe8   : > { %1498 = vmatmul.msk.bf16.vlgmr.msra.gmra.mxu2 %vm798_vm1, %v1539_v52  ;;  %1500 = vmatmul.msk.bf16.vlgmr.msra.gmra.mxu3 %vm798_vm1, %v1539_v52 }
  0xf8   : > { %1499 = vmatmul.msk.bf16.gmra.mxu2 %vm798_vm1, %v1540_v53  ;;  %1501 = vmatmul.msk.bf16.gmra.mxu3 %vm798_vm1, %v1540_v53 }
 0x16b   : > { %v814_v54 = vpop.f32.mrf.mxu2  ;;  %v833_v55 = vpop.f32.mrf.mxu3 }
 0x16c   : > { %v815_v5 = vadd.f32 %v814_v54, %v771_v2  ;;  %v834_v9 = vadd.f32 %v833_v55, %v771_v2 }
 0x16e   : > { %v843_v16 = vmul.f32 0.1, %v815_v5  ;;  %v844_v19 = vmul.f32 0.1, %v834_v9 }
 0x170   : > { %v851_v26 = vmax.f32 %v815_v5, %v843_v16  ;;  %v852_v27 = vmax.f32 %v834_v9, %v844_v19 }
 0x173   : > { %v816_v56 = vpop.f32.mrf.mxu2  ;;  %v835_v57 = vpop.f32.mrf.mxu3 }
 0x174   : > { %v817_v1 = vadd.f32 %v816_v56, %v776_v62  ;;  %v836_v3 = vadd.f32 %v835_v57, %v776_v62 }
 0x176   : > { %v845_v12 = vmul.f32 0.1, %v817_v1  ;;  %v846_v14 = vmul.f32 0.1, %v836_v3 }
 0x178   : > { %v853_v22 = vmax.f32 %v817_v1, %v845_v12  ;;  %v854_v24 = vmax.f32 %v836_v3, %v846_v14 }
 0x17a   : > { %v860_v28 = vpack.c.bf16 %v853_v22, %v851_v26  ;;  %v861_v29 = vpack.c.bf16 %v854_v24, %v852_v27 }
 0x17b   : > { %v819_v59 = vpop.f32.mrf.mxu2  ;;  %v838_v60 = vpop.f32.mrf.mxu3 }
 0x17c   : > { %v820_v61 = vadd.f32 %v819_v59, %v781_v58  ;;  %v839_v63 = vadd.f32 %v838_v60, %v781_v58 }
 0x17e   : > { %v847_v6 = vmul.f32 0.1, %v820_v61  ;;  %v848_v10 = vmul.f32 0.1, %v839_v63 }
 0x180   : > { %v855_v17 = vmax.f32 %v820_v61, %v847_v6  ;;  %v856_v20 = vmax.f32 %v839_v63, %v848_v10 }
 0x183   : > { %v821_v4 = vpop.f32.mrf.mxu2  ;;  %v840_v8 = vpop.f32.mrf.mxu3 }
 0x184   : > { %v822_v7 = vadd.f32 %v821_v4, %v786_v0  ;;  %v841_v11 = vadd.f32 %v840_v8, %v786_v0 }
 0x186   : > { %v849_v13 = vmul.f32 0.1, %v822_v7  ;;  %v850_v15 = vmul.f32 0.1, %v841_v11 }
 0x188   : > { %v857_v18 = vmax.f32 %v822_v7, %v849_v13  ;;  %v858_v21 = vmax.f32 %v841_v11, %v850_v15 }
 0x18a   : > { %v862_v23 = vpack.c.bf16 %v857_v18, %v855_v17  ;;  %v863_v25 = vpack.c.bf16 %v858_v21, %v856_v20 }
 0x18c   : > { %879 = vmatpush.bf16.msrb.mxu2 %v862_v23  ;;  %892 = vmatpush.bf16.msrb.mxu3 %v863_v25 }
 0x190   : > { %880 = vmatpush.bf16.msrb.mxu2 %v860_v28  ;;  %893 = vmatpush.bf16.msrb.mxu3 %v861_v29 }
 0x193   : > { %1502 = vmatmul.msk.bf16.vlgmr.msrb.gmra.mxu2 %vm649_vm0, %v859_v30  ;;  %1503 = vmatmul.msk.bf16.vlgmr.msrb.gmra.mxu3 %vm649_vm0, %v859_v30 }
 0x216   : > { %v882_v32 = vpop.f32.mrf.mxu2  ;;  %v895_v34 = vpop.f32.mrf.mxu3 }
 0x217   : > { %v883_v33 = vadd.f32 %v882_v32, %v868_v31  ;;  %v896_v35 = vadd.f32 %v895_v34, %v868_v31  ;;  %v1541_v34 = vld [vmem:[%s1934_s7] sm:$0xff] }
 0x219   : > { %v900_v40 = vsel %vm899_vm2, %v883_v33, -inf  ;;  %v907_v38 = vsel %vm899_vm2, %v896_v35, -inf }
 0x21a   : > { %v901_v41 = vrot.slane %v900_v40, 4  ;;  %v908_v42 = vrot.slane %v907_v38, 4 }
 0x21c   : > { %v902_v43 = vmax.f32 %v900_v40, %v901_v41  ;;  %v909_v44 = vmax.f32 %v907_v38, %v908_v42  ;;  %v1542_v41 = vld [vmem:[%s1934_s7 + $0x8] sm:$0xff] }
 0x21e   : > { %v903_v39 = vrot.slane %v902_v43, 2  ;;  %v884_v45 = vpop.f32.mrf.mxu2  ;;  %v910_v36 = vrot.slane %v909_v44, 2  ;;  %v897_v46 = vpop.f32.mrf.mxu3 }
 0x220   : > { %v904_v47 = vmax.f32 %v902_v43, %v903_v39  ;;  %v911_v48 = vmax.f32 %v909_v44, %v910_v36 }
 0x222   : > { %v905_v37 = vrot.slane %v904_v47, 1  ;;  %v912_v49 = vrot.slane %v911_v48, 1 }
 0x224   : > { %v906_v50 = vmax.f32 %v904_v47, %v905_v37  ;;  %v913_v51 = vmax.f32 %v911_v48, %v912_v49 }
 0x226   : > { %v914_v52 = vsub.f32 %v883_v33, %v906_v50  ;;  %v915_v53 = vsub.f32 %v896_v35, %v913_v51 }
 0x228   : > { %v916_v54 = vmul.f32 1.442695, %v914_v52  ;;  %v918_v55 = vmul.f32 1.442695, %v915_v53 }
 0x22a   : > { %1572 = vpow2.f32 %v916_v54 }
 0x22b   : > { %1574 = vpow2.f32 %v918_v55 }
 0x230   : > { %v1573_v56 = vpop.eup %1572 }
 0x231   : > { %v1575_v57 = vpop.eup %1574  ;;  %v920_v58 = vsel %vm899_vm2, %v1573_v56, 0.0 }
 0x232   : > { %v921_v59 = vrot.slane %v920_v58, 4  ;;  %v927_v60 = vsel %vm899_vm2, %v1575_v57, 0.0 }
 0x233   : > { %v928_v61 = vrot.slane %v927_v60, 4 }
 0x234   : > { %v922_v62 = vadd.f32 %v921_v59, %v920_v58 }
 0x235   : > { %v929_v63 = vadd.f32 %v928_v61, %v927_v60  ;;  %v1543_v60 = vld [vmem:[%s1935_s8] sm:$0xff] }
 0x236   : > { %v923_v0 = vrot.slane %v922_v62, 2 }
 0x237   : > { %v930_v1 = vrot.slane %v929_v63, 2 }
 0x238   : > { %v924_v2 = vadd.f32 %v923_v0, %v922_v62 }
 0x239   : > { %v931_v3 = vadd.f32 %v930_v1, %v929_v63  ;;  %v1057_v1 = vpop.permute.xlu1 %1056 }
 0x23a   : > { %v925_v4 = vrot.slane %v924_v2, 1 }
 0x23b   : > { %v932_v5 = vrot.slane %v931_v3, 1 }
 0x23c   : > { %v926_v6 = vadd.f32 %v925_v4, %v924_v2  ;;  %v1062_v4 = vpop.permute.xlu2 %1061 }
 0x23d   : > { %v933_v7 = vadd.f32 %v932_v5, %v931_v3 }
 0x23e   : > { %1576 = vrcp.f32 %v926_v6  ;;  %v945_v13 = vand.u32 2147483648, %v926_v6  ;;  %v943_v16 = vand.u32 2147483647, %v926_v6  ;;  %vm939_vm5 = vweird.f32 %v926_v6 }
 0x23f   : > { %1578 = vrcp.f32 %v933_v7  ;;  %v960_v17 = vand.u32 2147483648, %v933_v7  ;;  %v958_v19 = vand.u32 2147483647, %v933_v7  ;;  %vm954_vm7 = vweird.f32 %v933_v7 }
 0x240   : > { %v946_v21 = vor.u32 1.1754944e-38, %v945_v13  ;;  %vm944_vm8 = vcmp.eq.f32.partialorder %v943_v16, 8.507059e+37 }
 0x241   : > { %v961_v24 = vor.u32 1.1754944e-38, %v960_v17  ;;  %vm959_vm10 = vcmp.eq.f32.partialorder %v958_v19, 8.507059e+37 }
 0x244   : > { %v1577_v8 = vpop.eup %1576 }
 0x245   : > { %v1579_v9 = vpop.eup %1578  ;;  %v935_v10 = vmul.f32 %v1577_v8, %v926_v6  ;;  %vm940_vm3 = vweird.f32 %v1577_v8 }
 0x246   : > { %v950_v11 = vmul.f32 %v1579_v9, %v933_v7  ;;  %vm955_vm4 = vweird.f32 %v1579_v9  ;;  %vm941_vm6 = vmor %vm939_vm5, %vm940_vm3 }
 0x247   : > { %v936_v12 = vsub.f32 1.0, %v935_v10  ;;  %vm956_vm9 = vmor %vm954_vm7, %vm955_vm4 }
 0x248   : > { %v951_v14 = vsub.f32 1.0, %v950_v11 }
 0x249   : > { %v937_v15 = vmul.f32 %v1577_v8, %v936_v12 }
 0x24a   : > { %v952_v18 = vmul.f32 %v1579_v9, %v951_v14 }
 0x24b   : > { %v938_v20 = vadd.f32 %v1577_v8, %v937_v15 }
 0x24c   : > { %v953_v22 = vadd.f32 %v1579_v9, %v952_v18 }
 0x24d   : > { %v942_v23 = vsel %vm941_vm6, %v1577_v8, %v938_v20 }
 0x24e   : > { %v947_v25 = vsel %vm944_vm8, %v946_v21, %v942_v23  ;;  %v957_v26 = vsel %vm956_vm9, %v1579_v9, %v953_v22 }
 0x24f   : > { %v948_v27 = vmul.f32 %v1573_v56, %v947_v25  ;;  %v962_v28 = vsel %vm959_vm10, %v961_v24, %v957_v26 }
 0x250   : > { %v963_v29 = vmul.f32 %v1575_v57, %v962_v28 }
 0x251   : > { %v974_v30 = vpack.c.bf16 %v948_v27, %v948_v27 }
 0x252   : > { %v966_v31 = vrot.slane %v963_v29, 4  ;;  %v975_v32 = vpack.c.bf16 %v963_v29, %v963_v29 }
 0x253   : > { %v995_v33 = vsel %vm993_vm11, %v974_v30, 0 }
 0x254   : > { %1007 = vmatpush.bf16.msra.mxu2 %v995_v33  ;;  %v967_v35 = vsel %vm899_vm2, %v948_v27, %v966_v31  ;;  %v998_v40 = vsel %vm993_vm11, %v975_v32, 0  ;;  %v1108_v27 = vld [vmem:[%s1937_s10] sm:$0xf] }
 0x255   : > { %969 = vst [vmem:[%s548_s19] sm:$0xff] %v967_v35  ;;  %1026 = vmatpush.bf16.msra.mxu3 %v998_v40  ;;  %s558_s19 = scalar_lea.vmem %s1942_s15, %s1532_s27 }
 0x257   : > { %1512 = vmatmul.msk.bf16.vlgmr.msra.gmra.mxu2 %vm986_vm12, %v1541_v34 }
 0x258   : > { %1514 = vmatmul.msk.bf16.vlgmr.msra.gmra.mxu3 %vm986_vm12, %v1541_v34 }
 0x267   : > { %1513 = vmatmul.msk.bf16.gmra.mxu2 %vm986_vm12, %v1542_v41 }
 0x268   : > { %1515 = vmatmul.msk.bf16.gmra.mxu3 %vm986_vm12, %v1542_v41 }
 0x2da   : > { %v1819_v38 = vpop.f32.mrf.mxu2 }
 0x2db   : > { %v1821_v42 = vpop.f32.mrf.mxu3  ;;  %v1869_v56 = vmul.f32 %v1819_v38, %v1819_v38 }
 0x2dc   : > { %v1875_v58 = vmul.f32 %v1821_v42, %v1821_v42 }
 0x2e2   : > { %v1823_v43 = vpop.f32.mrf.mxu2 }
 0x2e3   : > { %v1825_v44 = vpop.f32.mrf.mxu3  ;;  %v1857_v52 = vmul.f32 %v1823_v43, %v1823_v43  ;;  %v1048_v57 = vpack.c.bf16 %v1823_v43, %v1819_v38 }
 0x2e4   : > { %v1863_v54 = vmul.f32 %v1825_v44, %v1825_v44  ;;  %v1049_v59 = vpack.c.bf16 %v1825_v44, %v1821_v42 }
 0x2e5   : > { %v1151_v61 = vpack.c.bf16 %v1857_v52, %v1869_v56 }
 0x2e6   : > { %v1152_v62 = vpack.c.bf16 %v1863_v54, %v1875_v58 }
 0x2ea   : > { %v1827_v39 = vpop.f32.mrf.mxu2 }
 0x2eb   : > { %v1829_v45 = vpop.f32.mrf.mxu3  ;;  %v1835_v46 = vmul.f32 %v1827_v39, %v1827_v39 }
 0x2ec   : > { %v1847_v49 = vmul.f32 %v1829_v45, %v1829_v45 }
 0x2f2   : > { %v1831_v36 = vpop.f32.mrf.mxu2 }
 0x2f3   : > { %v1839_v47 = vmul.f32 %v1831_v36, %v1831_v36  ;;  %v1841_v48 = vpop.f32.mrf.mxu3  ;;  %v1050_v37 = vpack.c.bf16 %v1831_v36, %v1827_v39 }
 0x2f4   : > { %v1851_v50 = vmul.f32 %v1841_v48, %v1841_v48  ;;  %v1051_v51 = vpack.c.bf16 %v1841_v48, %v1829_v45 }
 0x2f5   : > { %v1153_v53 = vpack.c.bf16 %v1839_v47, %v1835_v46  ;;  %1078 = vmatpush.bf16.msrb.mxu0 %v1050_v37 }
 0x2f6   : > { %v1154_v55 = vpack.c.bf16 %v1851_v50, %v1847_v49  ;;  %1092 = vmatpush.bf16.msrb.mxu1 %v1051_v51 }
 0x2f7   : > { %1161 = vmatpush.bf16.msrb.mxu2 %v1153_v53 }
 0x2f8   : > { %1175 = vmatpush.bf16.msrb.mxu3 %v1154_v55 }
 0x2f9   : > { %1079 = vmatpush.bf16.msrb.mxu0 %v1048_v57  ;;  %v1115_v57 = vpop.permute.xlu0 %1114 }
 0x2fa   : > { %1093 = vmatpush.bf16.msrb.mxu1 %v1049_v59 }
 0x2fb   : > { %1162 = vmatpush.bf16.msrb.mxu2 %v1151_v61 }
 0x2fc   : > { %1176 = vmatpush.bf16.msrb.mxu3 %v1152_v62  ;;  %1520 = vmatmul.msk.bf16.vlgmr.msrb.gmra.mxu0 %vm649_vm0, %v1543_v60 }
 0x2fd   : > { %1521 = vmatmul.msk.bf16.vlgmr.msrb.gmra.mxu1 %vm649_vm0, %v1543_v60 }
 0x2fe   : > { %1524 = vmatmul.msk.bf16.vlgmr.msrb.gmra.mxu2 %vm649_vm0, %v1543_v60 }
 0x2ff   : > { %1525 = vmatmul.msk.bf16.vlgmr.msrb.gmra.mxu3 %vm649_vm0, %v1543_v60 }
 0x379   : > { %v1081_v63 = vpop.f32.mrf.mxu0 }
 0x37a   : > { %v1095_v0 = vpop.f32.mrf.mxu1  ;;  %v1082_v2 = vadd.f32 %v1081_v63, %v1057_v1 }
 0x37b   : > { %v1096_v3 = vadd.f32 %v1095_v0, %v1057_v1 }
 0x37c   : > { %v1100_v7 = vmul.f32 0.1, %v1082_v2 }
 0x37d   : > { %v1101_v11 = vmul.f32 0.1, %v1096_v3 }
 0x37e   : > { %v1104_v15 = vmax.f32 %v1082_v2, %v1100_v7 }
 0x37f   : > { %v1105_v18 = vmax.f32 %v1096_v3, %v1101_v11 }
 0x381   : > { %v1083_v5 = vpop.f32.mrf.mxu0  ;;  %v1164_v6 = vpop.f32.mrf.mxu2 }
 0x382   : > { %v1084_v8 = vadd.f32 %v1083_v5, %v1062_v4  ;;  %v1097_v9 = vpop.f32.mrf.mxu1  ;;  %v1178_v10 = vpop.f32.mrf.mxu3  ;;  %v1165_v17 = vadd.f32 %v1164_v6, %v1057_v1 }
 0x383   : > { %v1098_v12 = vadd.f32 %v1097_v9, %v1062_v4  ;;  %v1179_v20 = vadd.f32 %v1178_v10, %v1057_v1 }
 0x384   : > { %v1102_v13 = vmul.f32 0.1, %v1084_v8  ;;  %v1183_v24 = vmul.f32 0.1, %v1165_v17 }
 0x385   : > { %v1103_v14 = vmul.f32 0.1, %v1098_v12  ;;  %v1184_v28 = vmul.f32 0.1, %v1179_v20 }
 0x386   : > { %v1106_v16 = vmax.f32 %v1084_v8, %v1102_v13  ;;  %v1187_v32 = vmax.f32 %v1165_v17, %v1183_v24 }
 0x387   : > { %v1107_v19 = vmax.f32 %v1098_v12, %v1103_v14  ;;  %v1188_v34 = vmax.f32 %v1179_v20, %v1184_v28  ;;  %v1231_v14 = vpop.permute.xlu1 %1230 }
 0x388   : > { %v1109_v21 = vpack.c.bf16 %v1106_v16, %v1104_v15 }
 0x389   : > { %v1110_v22 = vpack.c.bf16 %v1107_v19, %v1105_v18  ;;  %v1166_v23 = vpop.f32.mrf.mxu2 }
 0x38a   : > { %v1167_v25 = vadd.f32 %v1166_v23, %v1062_v4  ;;  %v1180_v26 = vpop.f32.mrf.mxu3  ;;  %1128 = vmatpush.bf16.msra.mxu0 %v1109_v21 }
 0x38b   : > { %v1181_v29 = vadd.f32 %v1180_v26, %v1062_v4  ;;  %1141 = vmatpush.bf16.msra.mxu1 %v1110_v22 }
 0x38c   : > { %v1185_v30 = vmul.f32 0.1, %v1167_v25 }
 0x38d   : > { %v1186_v31 = vmul.f32 0.1, %v1181_v29  ;;  %1522 = vmatmul.msk.bf16.vlgmr.msra.gmra.mxu0 %vm1117_vm13, %v1108_v27 }
 0x38e   : > { %v1189_v33 = vmax.f32 %v1167_v25, %v1185_v30  ;;  %1523 = vmatmul.msk.bf16.vlgmr.msra.gmra.mxu1 %vm1117_vm13, %v1108_v27  ;;  %v1251_v25 = vpop.permute.xlu2 %1250 }
 0x38f   : > { %v1190_v35 = vmax.f32 %v1181_v29, %v1186_v31  ;;  %v1253_v29 = vperm.slane %v1251_v25, 0 }
 0x390   : > { %v1191_v40 = vpack.c.bf16 %v1189_v33, %v1187_v32 }
 0x391   : > { %v1192_v41 = vpack.c.bf16 %v1190_v35, %v1188_v34 }
 0x392   : > { %1200 = vmatpush.bf16.msrb.mxu0 %v1191_v40 }
 0x393   : > { %1213 = vmatpush.bf16.msrb.mxu1 %v1192_v41 }
 0x39d   : > { %1526 = vmatmul.msk.bf16.vlgmr.msrb.gmra.mxu0 %vm1117_vm13, %v1108_v27 }
 0x39e   : > { %1527 = vmatmul.msk.bf16.vlgmr.msrb.gmra.mxu1 %vm1117_vm13, %v1108_v27 }
 0x40a   : > { %v1130_v37 = vpop.f32.mrf.mxu0 }
 0x40b   : > { %v1143_v51 = vpop.f32.mrf.mxu1  ;;  %v1131_v59 = vadd.f32 %v1130_v37, %v1115_v57 }
 0x40c   : > { %v1144_v60 = vadd.f32 %v1143_v51, %v1115_v57 }
 0x40d   : > { %v1147_v62 = vmul.f32 0.1, %v1131_v59 }
 0x40e   : > { %v1148_v1 = vmul.f32 0.1, %v1144_v60 }
 0x40f   : > { %v1149_v5 = vmax.f32 %v1131_v59, %v1147_v62 }
 0x410   : > { %v1150_v7 = vmax.f32 %v1144_v60, %v1148_v1 }
 0x412   : > { %v1132_v53 = vpop.f32.mrf.mxu0 }
 0x413   : > { %v1145_v55 = vpop.f32.mrf.mxu1 }
 0x41a   : > { %v1202_v61 = vpop.f32.mrf.mxu0 }
 0x41b   : > { %v1203_v63 = vadd.f32 %v1202_v61, %v1115_v57  ;;  %v1215_v0 = vpop.f32.mrf.mxu1 }
 0x41c   : > { %v1216_v2 = vadd.f32 %v1215_v0, %v1115_v57 }
 0x41d   : > { %v1219_v3 = vmul.f32 0.1, %v1203_v63 }
 0x41e   : > { %v1220_v4 = vmul.f32 0.1, %v1216_v2 }
 0x41f   : > { %v1221_v6 = vmax.f32 %v1203_v63, %v1219_v3 }
 0x420   : > { %v1222_v8 = vmax.f32 %v1216_v2, %v1220_v4 }
 0x421   : > { %v1223_v9 = vsub.f32 %v1149_v5, %v1221_v6 }
 0x422   : > { %v1224_v10 = vsub.f32 %v1150_v7, %v1222_v8  ;;  %v1204_v11 = vpop.f32.mrf.mxu0 }
 0x423   : > { %v1225_v12 = vand.u32 2147483647, %v1223_v9  ;;  %v1217_v13 = vpop.f32.mrf.mxu1 }
 0x424   : > { %v1226_v15 = vand.u32 2147483647, %v1224_v10 }
 0x425   : > { %v1233_v16 = vmul.f32 %v1231_v14, %v1225_v12 }
 0x426   : > { %v1234_v17 = vmul.f32 %v1231_v14, %v1226_v15 }
 0x427   : > { %v1235_v18 = vrot.slane %v1233_v16, 4 }
 0x428   : > { %v1241_v19 = vrot.slane %v1234_v17, 4 }
 0x429   : > { %v1236_v20 = vadd.f32 %v1235_v18, %v1233_v16 }
 0x42a   : > { %v1242_v21 = vadd.f32 %v1241_v19, %v1234_v17 }
 0x42b   : > { %v1237_v22 = vrot.slane %v1236_v20, 2 }
 0x42c   : > { %v1243_v23 = vrot.slane %v1242_v21, 2 }
 0x42d   : > { %v1238_v24 = vadd.f32 %v1237_v22, %v1236_v20 }
 0x42e   : > { %v1244_v26 = vadd.f32 %v1243_v23, %v1242_v21 }
 0x42f   : > { %v1239_v27 = vrot.slane %v1238_v24, 1 }
 0x430   : > { %v1245_v28 = vrot.slane %v1244_v26, 1 }
 0x431   : > { %v1240_v30 = vadd.f32 %v1239_v27, %v1238_v24 }
 0x432   : > { %v1246_v31 = vadd.f32 %v1245_v28, %v1244_v26 }
 0x433   : > { %v1254_v32 = vadd.f32 %v1253_v29, %v1240_v30 }
 0x434   : > { %v1255_v33 = vadd.f32 %v1253_v29, %v1246_v31 }
 0x435   : > { %v1528_v34 = vmul.f32 -1.442695, %v1254_v32 }
 0x436   : > { %v1529_v35 = vmul.f32 -1.442695, %v1255_v33 }
 0x437   : > { %1580 = vpow2.f32 %v1528_v34 }
 0x438   : > { %1582 = vpow2.f32 %v1529_v35 }
 0x43d   : > { %v1581_v40 = vpop.eup %1580 }
 0x43e   : > { %v1583_v41 = vpop.eup %1582  ;;  %v1262_v37 = vadd.f32 1.0, %v1581_v40 }
 0x43f   : > { %v1263_v51 = vadd.f32 1.0, %v1583_v41 }
 0x440   : > { %1584 = vrcp.f32 %v1262_v37  ;;  %v1275_v61 = vand.u32 2147483648, %v1262_v37  ;;  %v1273_v0 = vand.u32 2147483647, %v1262_v37  ;;  %vm1269_vm0 = vweird.f32 %v1262_v37 }
 0x441   : > { %1586 = vrcp.f32 %v1263_v51  ;;  %v1288_v2 = vand.u32 2147483647, %v1263_v51  ;;  %v1290_v3 = vand.u32 2147483648, %v1263_v51  ;;  %vm1284_vm2 = vweird.f32 %v1263_v51 }
 0x442   : > { %v1276_v5 = vor.u32 1.1754944e-38, %v1275_v61  ;;  %vm1274_vm3 = vcmp.eq.f32.partialorder %v1273_v0, 8.507059e+37 }
 0x443   : > { %vm1289_vm5 = vcmp.eq.f32.partialorder %v1288_v2, 8.507059e+37  ;;  %v1291_v10 = vor.u32 1.1754944e-38, %v1290_v3 }
 0x446   : > { %v1585_v53 = vpop.eup %1584 }
 0x447   : > { %v1587_v55 = vpop.eup %1586  ;;  %v1265_v57 = vmul.f32 %v1585_v53, %v1262_v37  ;;  %vm1270_vm14 = vweird.f32 %v1585_v53 }
 0x448   : > { %v1280_v59 = vmul.f32 %v1587_v55, %v1263_v51  ;;  %vm1285_vm15 = vweird.f32 %v1587_v55  ;;  %vm1271_vm1 = vmor %vm1269_vm0, %vm1270_vm14 }
 0x449   : > { %v1266_v60 = vsub.f32 1.0, %v1265_v57  ;;  %vm1286_vm4 = vmor %vm1284_vm2, %vm1285_vm15 }
 0x44a   : > { %v1281_v62 = vsub.f32 1.0, %v1280_v59 }
 0x44b   : > { %v1267_v63 = vmul.f32 %v1585_v53, %v1266_v60 }
 0x44c   : > { %v1282_v1 = vmul.f32 %v1587_v55, %v1281_v62 }
 0x44d   : > { %v1268_v4 = vadd.f32 %v1585_v53, %v1267_v63 }
 0x44e   : > { %v1283_v6 = vadd.f32 %v1587_v55, %v1282_v1 }
 0x44f   : > { %v1272_v7 = vsel %vm1271_vm1, %v1585_v53, %v1268_v4 }
 0x450   : > { %v1277_v8 = vsel %vm1274_vm3, %v1276_v5, %v1272_v7  ;;  %v1287_v9 = vsel %vm1286_vm4, %v1587_v55, %v1283_v6 }
 0x451   : > { %v1294_v11 = vmul.f32 %v1277_v8, %v1869_v56  ;;  %v1296_v12 = vmul.f32 %v1277_v8, %v1857_v52  ;;  %v1298_v13 = vmul.f32 %v1277_v8, %v1835_v46  ;;  %v1300_v14 = vmul.f32 %v1277_v8, %v1839_v47 }
 0x452   : > { %v1292_v15 = vsel %vm1289_vm5, %v1291_v10, %v1287_v9 }
 0x453   : > { %v1302_v16 = vadd.f32 %v1294_v11, %v1819_v38  ;;  %v1304_v17 = vadd.f32 %v1296_v12, %v1823_v43  ;;  %v1306_v18 = vadd.f32 %v1298_v13, %v1827_v39  ;;  %v1308_v56 = vadd.f32 %v1300_v14, %v1831_v36 }
 0x454   : > { %v1295_v52 = vmul.f32 %v1292_v15, %v1875_v58  ;;  %v1297_v46 = vmul.f32 %v1292_v15, %v1863_v54  ;;  %v1299_v47 = vmul.f32 %v1292_v15, %v1847_v49  ;;  %v1301_v19 = vmul.f32 %v1292_v15, %v1851_v50 }
 0x455   : > { %1310 = vst [vmem:[%s558_s19] sm:$0xff] %v1302_v16 }
 0x456   : > { %1312 = vst [vmem:[%s558_s19 + $0x10] sm:$0xff] %v1304_v17  ;;  %v1303_v20 = vadd.f32 %v1295_v52, %v1821_v42  ;;  %v1305_v38 = vadd.f32 %v1297_v46, %v1825_v44  ;;  %v1307_v43 = vadd.f32 %v1299_v47, %v1829_v45  ;;  %v1309_v39 = vadd.f32 %v1301_v19, %v1841_v48 }
 0x457   : > { %1314 = vst [vmem:[%s558_s19 + $0x20] sm:$0xff] %v1306_v18 }
 0x458   : > { %1316 = vst [vmem:[%s558_s19 + $0x30] sm:$0xff] %v1308_v56 }
 0x459   : > { %1311 = vst [vmem:[%s558_s19 + $0x8] sm:$0xff] %v1303_v20 }
 0x45a   : > { %1313 = vst [vmem:[%s558_s19 + $0x18] sm:$0xff] %v1305_v38 }
 0x45b   : > { %1315 = vst [vmem:[%s558_s19 + $0x28] sm:$0xff] %v1307_v43 }
 0x45c   : > { %1317 = vst [vmem:[%s558_s19 + $0x38] sm:$0xff] %v1309_v39 }
 0x45d PF: > { %s28_s22 = sadd.s32 1, %s1610_s22   ;;  %s1943_s20 = smov %s1606_s21 }
 0x45e   : > { %p25_p5 = scmp.ge.s32.totalorder %s28_s22, 4   ;;  %s1944_s21 = smov %s1946_s13 }
 0x460   :  { %27 = sbr.rel (!%p25_p5) target bundleno = 3 (0x3), region = 118 }

</bundles_post_ra>
